<compile_context>
chip_gen: v7x
topology: tpu7x:2x2x1
jax: 0.10.0
libtpu: 0.0.40
codegen_flags: <defaults>
</compile_context>

<pallas_src>
import jax
import jax.numpy as jnp
from jax.experimental import pallas as pl
from jax.experimental.pallas import tpu as pltpu

_BLOCK_BUDGET_BYTES = 2 << 20  # ~2 MiB per block (per array, before double-buffering)


def _normalize_kernel(m_ref, inv_ref, x_ref, o_ref):
    # m_ref, inv_ref: VMEM (row_tile, 1)        -- per-(b,c) mean / 1/std
    # x_ref, o_ref:   VMEM (row_tile, lane_tile) -- lane-dense spatial tile
    o_ref[...] = (x_ref[...] - m_ref[...]) * inv_ref[...]


def _largest_divisor_tile(extent: int, unit: int, max_tile: int) -> int:
    """Largest multiple-of-`unit` divisor of `extent` that is <= max_tile.

    Falls back to the full extent when `extent` is not a multiple of `unit`
    (a block equal to the full array dim is always legal).
    """
    if extent % unit != 0:
        return extent
    n = extent // unit
    best = unit
    for d in range(1, n + 1):
        if n % d == 0 and d * unit <= max_tile:
            best = d * unit
    return best


def normalize_layer(x: jax.Array, means: jax.Array, sds: jax.Array) -> jax.Array:
    """(x - means[c]) / sds[c], broadcast over batch and spatial dims. NCHW."""
    B, C, H, W = x.shape
    assert means.shape == (C,) and sds.shape == (C,)

    rows = B * C
    HW = H * W
    itemsize = jnp.dtype(x.dtype).itemsize

    # Lane tile: as large as possible while 8 rows of it stay within budget.
    lane_tile = _largest_divisor_tile(
        HW, 128, max(128, _BLOCK_BUDGET_BYTES // (8 * itemsize))
    )
    # Row tile: as many rows as fit the budget given the chosen lane tile.
    row_tile = _largest_divisor_tile(
        rows, 8, max(8, _BLOCK_BUDGET_BYTES // (lane_tile * itemsize))
    )
    n_row = rows // row_tile
    n_lane = HW // lane_tile

    # Free reshapes: NCHW is contiguous over (C, H, W).
    xf = x.reshape(rows, HW)
    m_rows = jnp.tile(means.astype(x.dtype), B).reshape(rows, 1)
    inv_rows = jnp.tile((1.0 / sds).astype(x.dtype), B).reshape(rows, 1)

    out = pl.pallas_call(
        _normalize_kernel,
        out_shape=jax.ShapeDtypeStruct((rows, HW), x.dtype),
        grid=(n_row, n_lane),
        in_specs=[
            pl.BlockSpec((row_tile, 1), lambda r, l: (r, 0)),          # means
            pl.BlockSpec((row_tile, 1), lambda r, l: (r, 0)),          # 1/sds
            pl.BlockSpec((row_tile, lane_tile), lambda r, l: (r, l)),  # x
        ],
        out_specs=pl.BlockSpec((row_tile, lane_tile), lambda r, l: (r, l)),
        compiler_params=pltpu.CompilerParams(
            dimension_semantics=("parallel", "parallel"),
        ),
    )(m_rows, inv_rows, xf)

    return out.reshape(B, C, H, W)


if __name__ == "__main__":
    B, C, H, W = 2, 4, 16, 16

    key = jax.random.PRNGKey(0)
    x = jax.random.normal(key, (B, C, H, W), dtype=jnp.float32)

    # Deterministic per-channel statistics (module __init__ takes lists of floats).
    means = jnp.array([0.485, 0.456, 0.406, 0.500], dtype=jnp.float32)
    sds = jnp.array([0.229, 0.224, 0.225, 0.250], dtype=jnp.float32)

    out = normalize_layer(x, means, sds)
    out = jax.block_until_ready(out)

    # Reference check in plain JAX (same broadcast semantics as the torch module).
    ref = (x - means[None, :, None, None]) / sds[None, :, None, None]
    assert out.shape == (B, C, H, W)
    assert jnp.allclose(out, ref, atol=1e-5, rtol=1e-5)

    print("KERNEL_OK")
</pallas_src>

<mosaic_0001>
module attributes {stable_mosaic.version = 11 : i64} {
  func.func @_normalize_kernel(%arg0: i32, %arg1: i32, %arg2: memref<8x1xf32, #tpu.memory_space<vmem>>, %arg3: memref<8x1xf32, #tpu.memory_space<vmem>>, %arg4: memref<8x256xf32, #tpu.memory_space<vmem>>, %arg5: memref<8x256xf32, #tpu.memory_space<vmem>>) attributes {dimension_semantics = [#tpu.dimension_semantics<parallel>, #tpu.dimension_semantics<parallel>], iteration_bounds = array<i64: 1, 1>, scalar_prefetch = 0 : i64, scratch_operands = 0 : i64, tpu.core_type = #tpu.core_type<tc>, window_params = [{transform_indices = @transform_0, window_bounds = array<i64: 8, 1>}, {transform_indices = @transform_1, window_bounds = array<i64: 8, 1>}, {transform_indices = @transform_2, window_bounds = array<i64: 8, 256>}, {transform_indices = @transform_3, window_bounds = array<i64: 8, 256>}]} {
    %c0 = arith.constant 0 : index
    %c0_0 = arith.constant 0 : index
    %0 = vector.load %arg4[%c0, %c0_0] : memref<8x256xf32, #tpu.memory_space<vmem>>, vector<8x256xf32>
    %c0_1 = arith.constant 0 : index
    %c0_2 = arith.constant 0 : index
    %1 = vector.load %arg2[%c0_1, %c0_2] : memref<8x1xf32, #tpu.memory_space<vmem>>, vector<8x1xf32>
    %2 = vector.broadcast %1 : vector<8x1xf32> to vector<8x256xf32>
    %3 = arith.subf %0, %2 : vector<8x256xf32>
    %c0_3 = arith.constant 0 : index
    %c0_4 = arith.constant 0 : index
    %4 = vector.load %arg3[%c0_3, %c0_4] : memref<8x1xf32, #tpu.memory_space<vmem>>, vector<8x1xf32>
    %5 = vector.broadcast %4 : vector<8x1xf32> to vector<8x256xf32>
    %6 = arith.mulf %3, %5 : vector<8x256xf32>
    %c0_5 = arith.constant 0 : index
    %c0_6 = arith.constant 0 : index
    %7 = vector.load %arg5[%c0_5, %c0_6] : memref<8x256xf32, #tpu.memory_space<vmem>>, vector<8x256xf32>
    tpu.vector_store %arg5[%c0_5, %c0_6], %6 {strides = array<i32>} : memref<8x256xf32, #tpu.memory_space<vmem>>, vector<8x256xf32>,
    return
  }
  func.func @transform_0(%arg0: i32, %arg1: i32) -> (i32, i32) {
    %c0_i32 = arith.constant 0 : i32
    %c0_i32_0 = arith.constant 0 : i32
    return %arg0, %c0_i32 : i32, i32
  }
  func.func @transform_1(%arg0: i32, %arg1: i32) -> (i32, i32) {
    %c0_i32 = arith.constant 0 : i32
    %c0_i32_0 = arith.constant 0 : i32
    return %arg0, %c0_i32 : i32, i32
  }
  func.func @transform_2(%arg0: i32, %arg1: i32) -> (i32, i32) {
    %c0_i32 = arith.constant 0 : i32
    return %arg0, %arg1 : i32, i32
  }
  func.func @transform_3(%arg0: i32, %arg1: i32) -> (i32, i32) {
    %c0_i32 = arith.constant 0 : i32
    return %arg0, %arg1 : i32, i32
  }
}

</mosaic_0001>

<bundles_post_ra>
// kernel: tpu_custom_call.1
= control target key start
LH: loop header
LB: loop body
LE: loop exit
PB: predicated region body
PF: predicated region fallthrough
CT: control target
= control target key end

     0   :  { %s122_s0 = inlined_call_operand.vmem [shape: f32[8,1], index: 0, kind: input, shape index: {}]   ;;  %s123_s1 = inlined_call_operand.vmem [shape: f32[8,1], index: 1, kind: input, shape index: {}]   ;;  %s124_s2 = inlined_call_operand.vmem [shape: f32[8,256], index: 2, kind: input, shape index: {}]   ;;  %s125_s3 = inlined_call_operand.hbm [shape: f32[8,256], index: 3, kind: output, shape index: {}]  }
   0x1   :  { %v17_v0 = vld [vmem:[%s122_s0] sm:$0xff] }
   0x2   :  { %8 = vsyncpa [#allocation3], 0  ;;  %v76_v1 = vmov 0   ;;  %v25_v2 = vld [vmem:[%s123_s1] sm:$0xff]  ;;  %v16_v5 = vld [vmem:[%s124_s2 + $0x8] sm:$0xff]  ;;  %s77_s20 = smov [#allocation2]  }
   0x3   :  { %51 = vset.pattern.permute.xlu0 %v76_v1  ;;  %v15_v4 = vld [vmem:[%s124_s2] sm:$0xff]  ;;  %s41_s0 = sshll.u32 %s77_s20, 4  ;;  %s42_s0 = int_to_ptr.vmem [resolvable:$true] %s41_s0 }
   0x4   :  { %20 = vperm.xlu0 %51, %v17_v0   ;;  %s52_s1 = scalar_lea.vmem %s42_s0, 256  ;;  %p57_p1 = scmp.lt.s32.totalorder %s42_s0, %s42_s0 }
   0x5   :  { %p53_p0 = scmp.ne.s32.totalorder %s42_s0, %s52_s1  ;;  %p58_p2 = scmp.lt.s32.totalorder %s52_s1, %s52_s1 }
   0x7   :  { %p59_p3 = por %p58_p2, %p57_p1 }
   0x8   :  { %28 = vperm.xlu0 %51, %v25_v2  }
   0x9   :  { %p60_p4 = pnand %p59_p3, %p53_p0 }
  0x83   :  { %v21_v3 = vpop.permute.xlu0 %20 }
  0x84   :  { %v23_v6 = vsub.f32 %v15_v4, %v21_v3  ;;  %v24_v7 = vsub.f32 %v16_v5, %v21_v3 }
  0x87   :  { %v29_v8 = vpop.permute.xlu0 %28 }
  0x88   :  { %v31_v9 = vmul.f32 %v29_v8, %v23_v6  ;;  %v32_v10 = vmul.f32 %v29_v8, %v24_v7 }
  0x8a   :  { %33 = vst [vmem:[#allocation2] sm:$0xff] %v31_v9  ;;  %34 = vst [vmem:[#allocation2 + $0x8] sm:$0xff] %v32_v10 }
  0x8b   :  { %63 = shalt.err (!%p60_p4)
}
  0x8c   :  { %s64_s2 = scalar_lea.hbm %s125_s3, 256 }
  0x8d   :  { %p65_p5 = scmp.ne.s32.totalorder %s125_s3, %s64_s2  ;;  %p68_p6 = scmp.lt.u32.totalorder %s64_s2, %s125_s3 }
  0x8f   :  { %p70_p7 = pnand %p68_p6, %p65_p5 }
  0x91   :  { %73 = shalt.err (!%p70_p7)
}
  0x92   :  { %44 = dma.vmem_to_hbm [thread:$0]  %s42_s0, 256, %s125_s3, [#allocation3]  }
  0x93   :  { %74 = dma.done.wait [#allocation3], 256  }
  0x94   :  { %75 = vsyncadd [#allocation3], 4294967040 }
  0x95   :  { %48 = vsyncpa [#allocation3], 1 }

</bundles_post_ra>
